<compile_context>
chip_gen: v7x
topology: tpu7x:2x2x1
jax: 0.10.0
libtpu: 0.0.40
codegen_flags: <defaults>
</compile_context>

<pallas_src>
import functools
import math

import jax
import jax.numpy as jnp
from jax.experimental import pallas as pl
from jax.experimental.pallas import tpu as pltpu


# ---------------------------------------------------------------------------
# PE-table construction (buffer init, mirrors nn.Module.__init__) -- plain JAX
# ---------------------------------------------------------------------------
def make_pe_table(max_len: int, d_model: int, dtype=jnp.float32) -> jnp.ndarray:
    position = jnp.arange(max_len, dtype=jnp.float32)[:, None]            # (L, 1)
    div_term = jnp.exp(
        jnp.arange(0, d_model, 2, dtype=jnp.float32)
        * (-(math.log(10000.0) / d_model))
    )                                                                      # (D/2,)
    angles = position * div_term                                           # (L, D/2)
    pe = jnp.zeros((max_len, d_model), dtype=jnp.float32)
    pe = pe.at[:, 0::2].set(jnp.sin(angles))
    pe = pe.at[:, 1::2].set(jnp.cos(angles))
    return pe.astype(dtype)


# ---------------------------------------------------------------------------
# Kernels (work for both the flattened 2-D layout and the 3-D layout; the PE
# block has a leading 1 that broadcasts over the batch dim of x).
# ---------------------------------------------------------------------------
def _pe_add_kernel(x_ref, pe_ref, o_ref):
    # In-kernel cast of the (already-in-VMEM) PE block: free VPU filler on a
    # memory-bound kernel, avoids a per-call full-table cast in the wrapper.
    o_ref[...] = x_ref[...] + pe_ref[...].astype(x_ref.dtype)


def _pe_add_dropout_hw_kernel(seed_ref, x_ref, pe_ref, o_ref, *, threshold, scale):
    # Training-mode inverted dropout using the TPU hardware PRNG.
    # Two seed words (user seed, grid step) -> distinct stream per tile.
    pltpu.prng_seed(seed_ref[0], pl.program_id(0))
    y = x_ref[...] + pe_ref[...].astype(x_ref.dtype)
    bits = pltpu.prng_random_bits(y.shape)
    if bits.dtype != jnp.int32:
        bits = pltpu.bitcast(bits, jnp.int32)
    # bits uniform over int32 [-2^31, 2^31); P(bits >= threshold) == 1 - p.
    keep = bits >= jnp.int32(threshold)
    o_ref[...] = jnp.where(
        keep, y * jnp.asarray(scale, dtype=y.dtype), jnp.zeros_like(y)
    ).astype(o_ref.dtype)


def _pe_add_dropout_bits_kernel(x_ref, pe_ref, bits_ref, o_ref, *, threshold, scale):
    # Portable dropout path: random int32 bits generated by jax.random in the
    # wrapper and streamed through the same tiling.
    y = x_ref[...] + pe_ref[...].astype(x_ref.dtype)
    keep = bits_ref[...] >= jnp.int32(threshold)
    o_ref[...] = jnp.where(
        keep, y * jnp.asarray(scale, dtype=y.dtype), jnp.zeros_like(y)
    ).astype(o_ref.dtype)


# ---------------------------------------------------------------------------
# Tile picking
# ---------------------------------------------------------------------------
def _default_target_bytes() -> int:
    # Generation-gated x-block size: ~4 MiB on v7x (64 MiB VMEM, 3.2 TB/s HBM
    # -> amortize the ~0.35us per-step overhead), ~2 MiB elsewhere so v5e's
    # 16 MiB default scoped VMEM is never exceeded.
    try:
        info = pltpu.get_tpu_info()
        if getattr(info, "vmem_capacity_bytes", 128 << 20) <= (64 << 20):
            return 4 << 20
    except Exception:
        pass
    return 2 << 20


def _pick_seq_tile(S, B, D, itemsize, target_bytes):
    """Largest multiple-of-8 divisor of S so B*TS*D*itemsize <~ target, >=2 tiles if possible."""
    if S % 8 != 0:
        return S                                  # only the full-extent block is legal
    bytes_per_row = max(1, B * D * itemsize)
    cap = max(8, (target_bytes // bytes_per_row) // 8 * 8)
    if S >= 16:                                   # >=2 grid tiles for v7x megacore
        cap = min(cap, max(8, (S // 2) // 8 * 8))
    ts = min(cap, S) // 8 * 8
    while ts >= 8:
        if S % ts == 0:
            return ts
        ts -= 8
    return S


def _pick_flat_tile(total, B, itemsize, target_bytes):
    """Largest multiple-of-128 divisor of total so B*T*itemsize <~ target, >=2 tiles if possible."""
    cap = max(128, (target_bytes // max(1, B * itemsize)) // 128 * 128)
    if total >= 256:                              # >=2 grid tiles for v7x megacore
        cap = min(cap, max(128, (total // 2) // 128 * 128))
    t = min(cap, total) // 128 * 128
    while t >= 128:
        if total % t == 0:
            return t
        t -= 128
    return total


def _with_prefetch(index_map):
    # Wrap a 1-D-grid index map so it also accepts the scalar-prefetch seed ref.
    def wrapped(g, _seed_ref):
        return index_map(g)
    return wrapped


# ---------------------------------------------------------------------------
# Wrapper (the "forward")
# ---------------------------------------------------------------------------
def positional_encoding(x, pe_table, *, dropout_p=0.1, training=False, seed=0,
                        use_hw_prng=None, target_block_bytes=None,
                        donate_x=False):
    B, S, D = x.shape
    max_len, d_model = pe_table.shape
    assert d_model == D and S <= max_len

    itemsize = jnp.dtype(x.dtype).itemsize
    if target_block_bytes is None:
        target_block_bytes = _default_target_bytes()
    apply_dropout = training and dropout_p > 0.0
    if use_hw_prng is None:
        # Hardware PRNG only lowers on a real TPU backend (not CPU interpret).
        use_hw_prng = jax.default_backend() == "tpu"

    # --- layout & tiling ---------------------------------------------------
    use_3d = (D % 128 == 0) or ((S * D) % 128 != 0)
    if use_3d:
        TS = _pick_seq_tile(S, B, D, itemsize, target_block_bytes)
        if S % TS != 0:
            TS = S
        grid = (S // TS,)
        x_in = x
        if TS % 8 == 0:
            # Zero-copy reshape; BlockSpec only DMAs the first S rows.
            pe_in = pe_table.reshape(1, max_len, D)
        else:
            # TS == S not a multiple of 8: block dims must equal the full PE dims.
            pe_in = pe_table[:S].reshape(1, S, D)
        x_block, x_map = (B, TS, D), (lambda s: (0, s, 0))
        pe_block, pe_map = (1, TS, D), (lambda s: (0, s, 0))
        out_dims = (B, S, D)
    else:
        total = S * D
        T = _pick_flat_tile(total, B, itemsize, target_block_bytes)
        grid = (total // T,)
        x_in = x.reshape(B, total)                       # free reshape
        pe_in = pe_table.reshape(1, max_len * D)         # free reshape; first S*D cols used
        x_block, x_map = (B, T), (lambda t: (0, t))
        pe_block, pe_map = (1, T), (lambda t: (0, t))
        out_dims = (B, total)

    out_struct = jax.ShapeDtypeStruct(out_dims, x.dtype)
    cparams = pltpu.CompilerParams(dimension_semantics=("parallel",))

    elem = B * S * D
    bytes_accessed = 2 * elem * itemsize + S * D * jnp.dtype(pe_table.dtype).itemsize
    if apply_dropout and not use_hw_prng:
        bytes_accessed += elem * 4
    cost = pl.CostEstimate(
        flops=(3 * elem if apply_dropout else elem),
        transcendentals=0,
        bytes_accessed=bytes_accessed,
    )

    # --- eval mode (dropout is identity) ------------------------------------
    if not apply_dropout:
        out = pl.pallas_call(
            _pe_add_kernel,
            out_shape=out_struct,
            grid=grid,
            in_specs=[pl.BlockSpec(x_block, x_map),
                      pl.BlockSpec(pe_block, pe_map)],
            out_specs=pl.BlockSpec(x_block, x_map),
            compiler_params=cparams,
            cost_estimate=cost,
            input_output_aliases=({0: 0} if donate_x else {}),
        )(x_in, pe_in)
        return out if use_3d else out.reshape(B, S, D)

    # --- training mode -------------------------------------------------------
    # Signed int32 threshold so that P(bits >= thr) == 1 - p.
    thr = int(round(dropout_p * (2 ** 32))) - 2 ** 31
    thr = max(min(thr, 2 ** 31 - 1), -(2 ** 31))
    scale = 1.0 / (1.0 - dropout_p)

    if use_hw_prng:
        seed_arr = jnp.asarray([seed], dtype=jnp.int32)
        grid_spec = pltpu.PrefetchScalarGridSpec(
            num_scalar_prefetch=1,
            grid=grid,
            in_specs=[pl.BlockSpec(x_block, _with_prefetch(x_map)),
                      pl.BlockSpec(pe_block, _with_prefetch(pe_map))],
            out_specs=pl.BlockSpec(x_block, _with_prefetch(x_map)),
        )
        out = pl.pallas_call(
            functools.partial(_pe_add_dropout_hw_kernel, threshold=thr, scale=scale),
            out_shape=out_struct,
            grid_spec=grid_spec,
            compiler_params=cparams,
            cost_estimate=cost,
            input_output_aliases=({1: 0} if donate_x else {}),
        )(seed_arr, x_in, pe_in)
    else:
        key = jax.random.PRNGKey(seed)
        bits = jax.lax.bitcast_convert_type(
            jax.random.bits(key, out_dims, dtype=jnp.uint32), jnp.int32)
        out = pl.pallas_call(
            functools.partial(_pe_add_dropout_bits_kernel, threshold=thr, scale=scale),
            out_shape=out_struct,
            grid=grid,
            in_specs=[pl.BlockSpec(x_block, x_map),
                      pl.BlockSpec(pe_block, pe_map),
                      pl.BlockSpec(x_block, x_map)],
            out_specs=pl.BlockSpec(x_block, x_map),
            compiler_params=cparams,
            cost_estimate=cost,
            input_output_aliases=({0: 0} if donate_x else {}),
        )(x_in, pe_in, bits)

    return out if use_3d else out.reshape(B, S, D)


# ---------------------------------------------------------------------------
# Demo / self-check
# ---------------------------------------------------------------------------
if __name__ == "__main__":
    DROPOUT_P = 0.1

    # --- case 1: d_model not 128-aligned -> flattened lane-dense layout -----
    B, S, D = 2, 8, 32
    MAX_LEN = 64
    key = jax.random.PRNGKey(0)
    x = jax.random.normal(key, (B, S, D), dtype=jnp.float32)
    pe_table = make_pe_table(MAX_LEN, D, dtype=jnp.float32)
    ref = x + pe_table[None, :S, :]

    out = positional_encoding(x, pe_table, dropout_p=DROPOUT_P, training=False)
    out = jax.block_until_ready(out)
    assert out.shape == (B, S, D)
    assert out.dtype == x.dtype
    assert jnp.allclose(out, ref, atol=1e-6, rtol=1e-6)

    # --- case 2: d_model 128-aligned -> 3-D (B, TS, D) layout ----------------
    B2, S2, D2 = 2, 16, 128
    x2 = jax.random.normal(jax.random.PRNGKey(1), (B2, S2, D2), dtype=jnp.float32)
    pe_table2 = make_pe_table(32, D2, dtype=jnp.float32)
    ref2 = x2 + pe_table2[None, :S2, :]
    out2 = jax.block_until_ready(
        positional_encoding(x2, pe_table2, dropout_p=DROPOUT_P, training=False))
    assert out2.shape == (B2, S2, D2)
    assert jnp.allclose(out2, ref2, atol=1e-6, rtol=1e-6)

    # --- training mode: kept elements == (x+pe)/(1-p), dropped are zero ------
    out_tr = positional_encoding(
        x, pe_table, dropout_p=DROPOUT_P, training=True, seed=42)
    out_tr = jax.block_until_ready(out_tr)
    assert out_tr.shape == (B, S, D)
    kept = out_tr != 0.0   # (genuine zeros of x+pe misread as dropped: harmless here)
    ref_scaled = ref * jnp.float32(1.0 / (1.0 - DROPOUT_P))
    assert jnp.allclose(
        jnp.where(kept, out_tr, 0.0),
        jnp.where(kept, ref_scaled, 0.0),
        atol=1e-5,
        rtol=1e-5,
    )

    print("KERNEL_OK")
</pallas_src>

<mosaic_0001>
module attributes {stable_mosaic.version = 11 : i64} {
  func.func @_pe_add_kernel(%arg0: i32, %arg1: memref<2x128xf32, #tpu.memory_space<vmem>>, %arg2: memref<1x128xf32, #tpu.memory_space<vmem>>, %arg3: memref<2x128xf32, #tpu.memory_space<vmem>>) attributes {dimension_semantics = [#tpu.dimension_semantics<parallel>], iteration_bounds = array<i64: 2>, scalar_prefetch = 0 : i64, scratch_operands = 0 : i64, tpu.core_type = #tpu.core_type<tc>, window_params = [{transform_indices = @transform_0, window_bounds = array<i64: 2, 128>}, {transform_indices = @transform_1, window_bounds = array<i64: 1, 128>}, {transform_indices = @transform_2, window_bounds = array<i64: 2, 128>}]} {
    %c0 = arith.constant 0 : index
    %c0_0 = arith.constant 0 : index
    %0 = vector.load %arg1[%c0, %c0_0] : memref<2x128xf32, #tpu.memory_space<vmem>>, vector<2x128xf32>
    %c0_1 = arith.constant 0 : index
    %c0_2 = arith.constant 0 : index
    %1 = vector.load %arg2[%c0_1, %c0_2] : memref<1x128xf32, #tpu.memory_space<vmem>>, vector<1x128xf32>
    %2 = vector.broadcast %1 : vector<1x128xf32> to vector<2x128xf32>
    %3 = arith.addf %0, %2 : vector<2x128xf32>
    %c0_3 = arith.constant 0 : index
    %c0_4 = arith.constant 0 : index
    %4 = vector.load %arg3[%c0_3, %c0_4] : memref<2x128xf32, #tpu.memory_space<vmem>>, vector<2x128xf32>
    tpu.vector_store %arg3[%c0_3, %c0_4], %3 {strides = array<i32>} : memref<2x128xf32, #tpu.memory_space<vmem>>, vector<2x128xf32>,
    return
  }
  func.func @transform_0(%arg0: i32) -> (i32, i32) {
    %c0_i32 = arith.constant 0 : i32
    %c0_i32_0 = arith.constant 0 : i32
    return %c0_i32, %arg0 : i32, i32
  }
  func.func @transform_1(%arg0: i32) -> (i32, i32) {
    %c0_i32 = arith.constant 0 : i32
    %c0_i32_0 = arith.constant 0 : i32
    return %c0_i32, %arg0 : i32, i32
  }
  func.func @transform_2(%arg0: i32) -> (i32, i32) {
    %c0_i32 = arith.constant 0 : i32
    %c0_i32_0 = arith.constant 0 : i32
    return %c0_i32, %arg0 : i32, i32
  }
}

</mosaic_0001>

<bundles_post_ra>
// kernel: tpu_custom_call.1
= control target key start
LH: loop header
LB: loop body
LE: loop exit
PB: predicated region body
PF: predicated region fallthrough
CT: control target
= control target key end

     0   :  { %7 = vsyncpa [#allocation3], 0  ;;  %s726_s0 = inlined_call_operand.hbm [shape: f32[2,256], index: 0, kind: input, shape index: {}]   ;;  %s727_s1 = inlined_call_operand.hbm [shape: f32[1,2048], index: 1, kind: input, shape index: {}]   ;;  %s728_s2 = inlined_call_operand.hbm [shape: f32[2,256], index: 2, kind: output, shape index: {}]  }
   0x1   :  { %9 = vsyncpa [#allocation3 + $0x1], 0 }
   0x2   :  { %10 = vsyncpa [#allocation6], 0 }
   0x3   :  { %12 = vsyncpa [#allocation6 + $0x1], 0 }
   0x4   :  { %13 = vsyncpa [#allocation4], 0 }
   0x5   :  { %15 = vsyncpa [#allocation4 + $0x1], 0  ;;  %s522_s9 = smov 0   ;;  %s524_s10 = smov 0  }
   0x6   :  { %s526_s11 = smov 0   ;;  %s528_s12 = smov 0  }
   0x7 LB: > { %s543_s13 = sadd.s32 4294967295, %s502_s12   ;;  %s307_s14 = sadd.s32 4294967294, %s502_s12   ;;  %s502_s12 = sphi %s528_s12, %s747_s12   ;;  %s498_s11 = sphi %s526_s11, %s746_s11   ;;  %s494_s10 = sphi %s524_s10, %s745_s10   ;;  %s490_s9 = sphi %s522_s9, %s744_s9  }
   0x8   : > { %s547_s15 = sadd.s32 1, %s502_s12   ;;  %s28_s16 = sadd.s32 1, %s498_s11 }
   0x9   : > { %s25_s17 = ssub.s32 %s502_s12, %s547_s15  ;;  %p35_p0 = scmp.ne.s32.totalorder %s498_s11, %s494_s10 }
   0xa   : > { %p26_p1 = scmp.eq.s32.totalorder %s25_s17, 0  ;;  %p36_p2 = scmp.eq.s32.totalorder %s502_s12, 0 }
   0xb   : > { %p41_p3 = scmp.ne.s32.totalorder %s494_s10, %s490_s9  ;;  %p42_p4 = scmp.eq.s32.totalorder %s543_s13, 0 }
   0xc   : > { %s559_s18 = scalar_select %p26_p1, %s498_s11, %s28_s16  }
   0xd   : > { %p561_p5 = por %p36_p2, %p35_p0  ;;  %p565_p6 = por %p42_p4, %p41_p3 }
   0xe   : > { %p91_p7 = scmp.eq.s32.totalorder %s543_s13, 1  ;;  %p97_p8 = scmp.eq.s32.totalorder %s307_s14, 1 }
   0xf   : > { %s732_s20 = scalar_select %p565_p6, 1, 0 }
  0x10   : > { %p338_p10 = scmp.lt.s32.totalorder %s502_s12, 2  ;;  %p572_p11 = por %p91_p7, %p35_p0 }
  0x11   : > { %p576_p12 = por %p97_p8, %p41_p3  ;;  %s581_s23 = sand.u32 1, %s498_s11  }
  0x12   : > { %s733_s21 = scalar_select %p572_p11, 1, 0 }
  0x13   : > { %s734_s22 = scalar_select %p576_p12, 1, 0 }
  0x14   : > { %s311_s24 = sshll.u32 %s502_s12, 5  ;;  %s310_s25 = sshll.u32 %s581_s23, 1 }
  0x15   : > { %s588_s28 = scalar_lea.hbm %s726_s0, %s311_s24  ;;  %s121_s29 = scalar_lea.vmem [#allocation2], %s310_s25 }
  0x16   : > { %s128_s30 = sshll.u32 %s121_s29, 4  ;;  %p592_p13 = pnand %p338_p10, %p561_p5  ;;  %s596_s30 = int_to_ptr.vmem [resolvable:$true] %s128_s30 }
  0x17   : > { %s118_s4 = scalar_lea.sflag [#allocation3], %s581_s23  ;;  %s372_s5 = scalar_lea.hbm %s588_s28, 32 }
  0x18   : > { %p373_p2 = scmp.ne.s32.totalorder %s588_s28, %s372_s5  ;;  %p374_p3 = pneg %p592_p13 }
  0x19   : > { %s377_s8 = scalar_lea.hbm %s726_s0, 64  ;;  %p378_p5 = scmp.lt.u32.totalorder %s588_s28, %s726_s0 }
  0x1a   : > { %p375_p4 = pnand %p374_p3, %p373_p2  ;;  %p379_p8 = scmp.lt.u32.totalorder %s377_s8, %s372_s5 }
  0x1b   : > { %p381_p9 = scmp.lt.u32.totalorder %s372_s5, %s588_s28 }
  0x1c   : > { %p376_p7 = pneg %p375_p4  ;;  %p380_p10 = por %p379_p8, %p378_p5 }
  0x1e   : > { %p382_p0 = por %p381_p9, %p380_p10 }
  0x20   : > { %p383_p1 = pnand %p382_p0, %p376_p7 }
  0x22   : > { %386 = shalt.err (!%p383_p1)
}
  0x23   : > { %s387_s17 = scalar_lea.vmem %s596_s30, 32  ;;  %s504_s19 = smov [#allocation2]  }
  0x24   : > { %p388_p2 = scmp.ne.s32.totalorder %s596_s30, %s387_s17  ;;  %s392_s24 = sshll.u32 %s504_s19, 4  ;;  %s393_s24 = int_to_ptr.vmem [resolvable:$false] %s392_s24 }
  0x25   : > { %s394_s25 = scalar_lea.vmem %s393_s24, 64  ;;  %p395_p11 = scmp.lt.s32.totalorder %s596_s30, %s393_s24 }
  0x26   : > { %p390_p4 = pnand %p388_p2, %p374_p3  ;;  %p396_p5 = scmp.lt.s32.totalorder %s394_s25, %s387_s17 }
  0x28   : > { %p391_p12 = pneg %p390_p4  ;;  %p397_p8 = por %p396_p5, %p395_p11 }
  0x2a   : > { %p398_p9 = pnand %p397_p8, %p391_p12 }
  0x2c   : > { %401 = shalt.err (!%p398_p9)
}
  0x2d   : > { %330 = dma.hbm_to_vmem [thread:$0]  (!%p592_p13), %s588_s28, 32, %s596_s30, %s118_s4  }
  0x2e   : > { %p736_p0 = scmp.lt.s32.totalorder %s502_s12, 3  ;;  %p737_p1 = scmp.ge.s32.totalorder %s502_s12, 1 }
  0x2f   : > { %s312_s27 = sshll.u32 %s502_s12, 4  ;;  %s138_s7 = scalar_lea.vmem [#allocation5], %s581_s23 }
  0x30   : > { %p630_p7 = pnand %p737_p1, %p736_p0  ;;  %s638_s6 = scalar_lea.hbm %s727_s1, %s312_s27 }
  0x31   : > { %s145_s8 = sshll.u32 %s138_s7, 4  ;;  %s136_s28 = scalar_lea.sflag [#allocation6], %s581_s23  ;;  %s146_s8 = int_to_ptr.vmem [resolvable:$true] %s145_s8 }
  0x32   : > { %s738_s26 = scalar_select %p630_p7, 1, 0 }
  0x33   : > { %s402_s30 = scalar_lea.hbm %s638_s6, 16  ;;  %s407_s16 = scalar_lea.hbm %s727_s1, 256 }
  0x34   : > { %p403_p11 = scmp.ne.s32.totalorder %s638_s6, %s402_s30  ;;  %p408_p2 = scmp.lt.u32.totalorder %s638_s6, %s727_s1 }
  0x35   : > { %p409_p4 = scmp.lt.u32.totalorder %s407_s16, %s402_s30  ;;  %p411_p8 = scmp.lt.u32.totalorder %s402_s30, %s638_s6 }
  0x36   : > { %p405_p12 = pnand %p403_p11, %p374_p3 }
  0x37   : > { %p410_p5 = por %p409_p4, %p408_p2 }
  0x38   : > { %p406_p10 = pneg %p405_p12 }
  0x39   : > { %p412_p9 = por %p411_p8, %p410_p5 }
  0x3b   : > { %p413_p0 = pnand %p412_p9, %p406_p10 }
  0x3d   : > { %416 = shalt.err (!%p413_p0)
}
  0x3e   : > { %s417_s23 = scalar_lea.vmem %s146_s8, 16  ;;  %s505_s24 = smov [#allocation5]  }
  0x3f   : > { %p418_p1 = scmp.ne.s32.totalorder %s146_s8, %s417_s23  ;;  %s422_s25 = sshll.u32 %s505_s24, 4  ;;  %s423_s25 = int_to_ptr.vmem [resolvable:$false] %s422_s25 }
  0x40   : > { %s424_s27 = scalar_lea.vmem %s423_s25, 32  ;;  %p425_p6 = scmp.lt.s32.totalorder %s146_s8, %s423_s25 }
  0x41   : > { %p420_p11 = pnand %p418_p1, %p374_p3  ;;  %p426_p7 = scmp.lt.s32.totalorder %s424_s27, %s417_s23 }
  0x43   : > { %p421_p12 = pneg %p420_p11  ;;  %p427_p2 = por %p426_p7, %p425_p6 }
  0x45   : > { %p428_p4 = pnand %p427_p2, %p421_p12 }
  0x47   : > { %431 = shalt.err (!%p428_p4)
}
  0x48   : > { %333 = dma.hbm_to_vmem [thread:$0]  (!%p592_p13), %s638_s6, 16, %s146_s8, %s136_s28  }
  0x49   : > { %p739_p10 = scmp.ne.s32.totalorder %s738_s26, 0 }
  0x4a   : > { %s664_s29 = sand.u32 (!%p739_p10), 1, %s494_s10   ;;  %p740_p3 = scmp.ne.s32.totalorder (!%p739_p10), %s732_s20, 0 }
  0x4b   : > { %154 = sbr.rel (%p739_p10) target bundleno = 111 (0x6f), region = 28  ;;  %s314_s5 = sshll.u32 (!%p739_p10), %s664_s29, 1 }
  0x4c   : > { %s157_s7 = scalar_lea.sflag (!%p739_p10), [#allocation3], %s664_s29  ;;  %s160_s30 = scalar_lea.vmem (!%p739_p10), [#allocation2], %s314_s5 }
  0x52   : > { %477 = dma.done.wait (%p740_p3), %s157_s7, 32  }
  0x53   : > { %479 = vsyncadd (%p740_p3), %s157_s7, 4294967264  ;;  %s166_s3 = scalar_lea.sflag [#allocation6], %s664_s29  ;;  %s168_s26 = scalar_lea.vmem [#allocation5], %s664_s29 }
  0x54   : > { %481 = dma.done.wait (%p740_p3), %s166_s3, 16  }
  0x55   : > { %483 = vsyncadd (%p740_p3), %s166_s3, 4294967280  ;;  %s192_s6 = scalar_lea.vmem [#allocation7], %s314_s5  ;;  %s318_s28 = sshll.u32 %s543_s13, 5  ;;  %v193_v0 = vld [vmem:[%s160_s30] sm:$0x3] }
  0x56   : > { %s217_s8 = sshll.u32 %s192_s6, 4  ;;  %v316_v1 = vld [vmem:[%s168_s26] ss:$0 sm:$0xff]  ;;  %s684_s16 = scalar_lea.hbm %s728_s2, %s318_s28  ;;  %s679_s8 = int_to_ptr.vmem [resolvable:$true] %s217_s8 }
  0x57   : > { %v201_v2 = vadd.f32 %v316_v1, %v193_v0  ;;  %s204_s20 = scalar_lea.sflag [#allocation4], %s664_s29  ;;  %s432_s17 = scalar_lea.vmem %s679_s8, 32 }
  0x58   : > { %p433_p6 = scmp.ne.s32.totalorder %s679_s8, %s432_s17  ;;  %p741_p13 = scmp.ne.s32.totalorder %s733_s21, 0 }
  0x59   : > { %202 = vst [vmem:[%s192_s6] sm:$0x3] %v201_v2  ;;  %s506_s13 = smov [#allocation7]  }
  0x5a   : > { %p434_p7 = pnand %p433_p6, %p741_p13  ;;  %s436_s19 = sshll.u32 %s506_s13, 4  ;;  %s437_s19 = int_to_ptr.vmem [resolvable:$false] %s436_s19 }
  0x5b   : > { %s438_s23 = scalar_lea.vmem %s437_s19, 64  ;;  %p439_p8 = scmp.lt.s32.totalorder %s679_s8, %s437_s19 }
  0x5c   : > { %p435_p5 = pneg %p434_p7  ;;  %p440_p9 = scmp.lt.s32.totalorder %s438_s23, %s432_s17 }
  0x5e   : > { %p441_p0 = por %p440_p9, %p439_p8 }
  0x60   : > { %p442_p1 = pnand %p441_p0, %p435_p5 }
  0x62   : > { %445 = shalt.err (!%p442_p1)
}
  0x63   : > { %s446_s24 = scalar_lea.hbm %s684_s16, 32  ;;  %s450_s29 = scalar_lea.hbm %s728_s2, 64 }
  0x64   : > { %p447_p11 = scmp.ne.s32.totalorder %s684_s16, %s446_s24  ;;  %p451_p4 = scmp.lt.u32.totalorder %s684_s16, %s728_s2 }
  0x65   : > { %p452_p10 = scmp.lt.u32.totalorder %s450_s29, %s446_s24  ;;  %p454_p6 = scmp.lt.u32.totalorder %s446_s24, %s684_s16 }
  0x66   : > { %p448_p12 = pnand %p447_p11, %p741_p13 }
  0x67   : > { %p453_p3 = por %p452_p10, %p451_p4 }
  0x68   : > { %p449_p2 = pneg %p448_p12 }
  0x69   : > { %p455_p7 = por %p454_p6, %p453_p3 }
  0x6b   : > { %p456_p5 = pnand %p455_p7, %p449_p2 }
  0x6d   : > { %459 = shalt.err (!%p456_p5)
}
  0x6e   : > { %325 = dma.vmem_to_hbm [thread:$0]  (%p741_p13), %s679_s8, 32, %s684_s16, %s204_s20  }
  0x6f PF: > { %s229_s30 = sand.u32 1, %s490_s9   ;;  %p742_p8 = scmp.ne.s32.totalorder %s734_s22, 0 }
  0x70   : > { %p743_p9 = scmp.ge.s32.totalorder %s502_s12, 2  ;;  %s230_s3 = scalar_lea.sflag [#allocation4], %s229_s30 }
  0x72   : > { %p335_p0 = pnand %p743_p9, %p742_p8 }
  0x74   : > { %485 = dma.done.wait (!%p335_p0), %s230_s3, 32  }
  0x75   : > { %487 = vsyncadd (!%p335_p0), %s230_s3, 4294967264  ;;  %p18_p1 = scmp.ge.s32.totalorder %s547_s15, 4   ;;  %s744_s9 = smov %s494_s10 }
  0x76   : > { %s745_s10 = smov %s498_s11  ;;  %s746_s11 = smov %s559_s18 }
  0x77   : > { %s747_s12 = smov %s547_s15  ;;  %20 = sbr.rel (!%p18_p1) target bundleno = 7 (0x7), region = 86 }
  0x7e   :  { %235 = vsyncpa [#allocation3], 1 }
  0x7f   :  { %237 = vsyncpa [#allocation3 + $0x1], 1 }
  0x80   :  { %238 = vsyncpa [#allocation6], 1 }
  0x81   :  { %240 = vsyncpa [#allocation6 + $0x1], 1 }
  0x82   :  { %241 = vsyncpa [#allocation4], 1 }
  0x83   :  { %243 = vsyncpa [#allocation4 + $0x1], 1 }

</bundles_post_ra>
